<compile_context>
chip_gen: v5e
topology: v5e:2x2
jax: 0.10.0
libtpu: 0.0.40
codegen_flags: <defaults>
</compile_context>

<pallas_src>
import jax
import jax.numpy as jnp
from jax.experimental import pallas as pl
from jax.experimental.pallas import tpu as pltpu


def _make_kernel(B, Cin, Cout, H, W):
    """Build the single-step kernel (all sizes are static / closed over)."""
    HW = H * W
    BC = B * Cin

    def kernel(x_ref, wd_ref, wp_ref, bp_ref, o_ref):
        # x_ref : (B*Cin, (H+4)*W)  H-padded (2 zero rows top/bottom), lane-dense
        # wd_ref: (B*Cin, 9)        depthwise taps, tap = kh*3 + kw, tiled over B
        # wp_ref: (Cout, Cin)       pointwise weights
        # bp_ref: (Cout, 1)         effective bias = wp @ bd + bp
        # o_ref : (B*Cout, H*W)     lane-dense output block
        x = x_ref[...].astype(jnp.float32)
        wd = wd_ref[...].astype(jnp.float32)
        wp = wp_ref[...].astype(jnp.float32)

        # Hoisted: boundary lane masks (output column = lane % W) and bias bcast.
        col = jax.lax.broadcasted_iota(jnp.int32, (1, HW), 1) % W
        mask_l = col != 0        # kw == 0 reads column w-1: invalid at w == 0
        mask_r = col != (W - 1)  # kw == 2 reads column w+1: invalid at w == W-1
        bias = jnp.broadcast_to(bp_ref[...].astype(jnp.float32), (Cout, HW))

        # ---- depthwise 3x3: 9 lane-offset slices of the flat block (VPU FMAs,
        # lane shifts go to the XLU slot).  Taps grouped by kw so each boundary
        # mask is applied exactly once. ----
        acc = jnp.zeros((BC, HW), jnp.float32)
        for kw in range(3):
            part = jnp.zeros((BC, HW), jnp.float32)
            for kh in range(3):
                tap = kh * 3 + kw
                s = (kh + 1) * W + kw - 1          # flat start, always in range
                part = part + x[:, s:s + HW] * wd[:, tap:tap + 1]
            if kw == 0:
                part = jnp.where(mask_l, part, 0.0)
            elif kw == 2:
                part = jnp.where(mask_r, part, 0.0)
            acc = acc + part

        # ---- pointwise 1x1 as unrolled VPU FMAs (MXU not worth it at K=Cin=4).
        # acc row r = b*Cin + ci feeds output rows [b*Cout, (b+1)*Cout). ----
        for b in range(B):
            out_b = bias
            for ci in range(Cin):
                r = b * Cin + ci
                out_b = out_b + wp[:, ci:ci + 1] * acc[r:r + 1, :]
            o_ref[b * Cout:(b + 1) * Cout, :] = out_b.astype(o_ref.dtype)

    return kernel


def depthwise_separable_conv(x_nchw, wd, bd, wp, bp):
    """x_nchw: (B, Cin, H, W); wd: (Cin,1,3,3); bd: (Cin,); wp: (Cout,Cin,1,1); bp: (Cout,)."""
    B, Cin, H, W = x_nchw.shape
    Cout = wp.shape[0]
    HW = H * W
    Hp = H + 4  # 2 zero rows top + 2 zero rows bottom

    # Pad H only; W stays unpadded so each channel image flattens to a
    # contiguous, lane-dense row.  Rows {1, H+2} act as the original zero pad
    # row; rows {0, H+3} are guard rows that keep every tap slice in range
    # (their contributions are either zero or masked).
    x_pad = jnp.pad(x_nchw, ((0, 0), (0, 0), (2, 2), (0, 0)))
    x_flat = x_pad.reshape(B * Cin, Hp * W)            # contiguous, no data movement

    wd_k = jnp.tile(wd.reshape(Cin, 9), (B, 1))        # (B*Cin, 9), row = b*Cin + ci
    wp_k = wp[:, :, 0, 0].astype(jnp.float32)          # (Cout, Cin)
    # Fold depthwise bias into pointwise bias: wp @ (dw + bd) + bp == wp@dw + (wp@bd + bp).
    # Exact because there is no nonlinearity between the two convs.
    bp_eff = (jnp.dot(wp_k, bd.astype(jnp.float32))
              + bp.astype(jnp.float32)).reshape(Cout, 1)

    kernel = _make_kernel(B, Cin, Cout, H, W)

    out_flat = pl.pallas_call(
        kernel,
        out_shape=jax.ShapeDtypeStruct((B * Cout, HW), x_nchw.dtype),
        grid_spec=pltpu.PrefetchScalarGridSpec(
            num_scalar_prefetch=0,
            grid=(1,),  # collapsed: single step, whole batch (B folded into sublanes)
            in_specs=[
                pl.BlockSpec((B * Cin, Hp * W), lambda i: (0, 0)),
                pl.BlockSpec((B * Cin, 9), lambda i: (0, 0)),
                pl.BlockSpec((Cout, Cin), lambda i: (0, 0)),
                pl.BlockSpec((Cout, 1), lambda i: (0, 0)),
            ],
            out_specs=pl.BlockSpec((B * Cout, HW), lambda i: (0, 0)),
        ),
        compiler_params=pltpu.CompilerParams(
            dimension_semantics=("arbitrary",)),
    )(x_flat, wd_k, wp_k, bp_eff)

    # (B*Cout, H*W) -> (B, Cout, H, W): contiguous split, no data movement.
    return out_flat.reshape(B, Cout, H, W)


def _reference(x_nchw, wd, bd, wp, bp):
    """Pure-JAX reference (lax conv) matching PyTorch semantics."""
    Cin = x_nchw.shape[1]
    dn = ("NCHW", "OIHW", "NCHW")
    dw = jax.lax.conv_general_dilated(
        x_nchw, wd, window_strides=(1, 1), padding=((1, 1), (1, 1)),
        dimension_numbers=dn, feature_group_count=Cin)
    dw = dw + bd.reshape(1, Cin, 1, 1)
    pt = jax.lax.conv_general_dilated(
        dw, wp, window_strides=(1, 1), padding=((0, 0), (0, 0)),
        dimension_numbers=dn)
    pt = pt + bp.reshape(1, wp.shape[0], 1, 1)
    return pt


if __name__ == "__main__":
    key = jax.random.PRNGKey(0)
    B, Cin, H, W = 2, 4, 16, 16
    Cout = 8

    k0, k1, k2, k3, k4 = jax.random.split(key, 5)
    x = jax.random.normal(k0, (B, Cin, H, W), dtype=jnp.float32)
    # Deterministic synthetic parameters (PyTorch shapes):
    wd = jax.random.normal(k1, (Cin, 1, 3, 3), dtype=jnp.float32) * 0.1     # depthwise weight
    bd = jax.random.normal(k2, (Cin,), dtype=jnp.float32) * 0.1             # depthwise bias
    wp = jax.random.normal(k3, (Cout, Cin, 1, 1), dtype=jnp.float32) * 0.1  # pointwise weight
    bp = jax.random.normal(k4, (Cout,), dtype=jnp.float32) * 0.1            # pointwise bias

    out = depthwise_separable_conv(x, wd, bd, wp, bp)
    out = jax.block_until_ready(out)

    ref = _reference(x, wd, bd, wp, bp)
    assert out.shape == (B, Cout, H, W)
    assert jnp.allclose(out, ref, atol=1e-4, rtol=1e-4)

    print("KERNEL_OK")
</pallas_src>

<mosaic_0001>
module attributes {stable_mosaic.version = 11 : i64} {
  func.func @kernel(%arg0: i32, %arg1: memref<8x320xf32, #tpu.memory_space<vmem>>, %arg2: memref<8x9xf32, #tpu.memory_space<vmem>>, %arg3: memref<8x4xf32, #tpu.memory_space<vmem>>, %arg4: memref<8x1xf32, #tpu.memory_space<vmem>>, %arg5: memref<16x256xf32, #tpu.memory_space<vmem>>) attributes {dimension_semantics = [#tpu.dimension_semantics<arbitrary>], iteration_bounds = array<i64: 1>, scalar_prefetch = 0 : i64, scratch_operands = 0 : i64, tpu.core_type = #tpu.core_type<tc>, window_params = [{pipeline_mode = #tpu.pipeline_mode<synchronous>, transform_indices = @transform_0, window_bounds = array<i64: 8, 320>}, {pipeline_mode = #tpu.pipeline_mode<synchronous>, transform_indices = @transform_1, window_bounds = array<i64: 8, 9>}, {pipeline_mode = #tpu.pipeline_mode<synchronous>, transform_indices = @transform_2, window_bounds = array<i64: 8, 4>}, {pipeline_mode = #tpu.pipeline_mode<synchronous>, transform_indices = @transform_3, window_bounds = array<i64: 8, 1>}, {pipeline_mode = #tpu.pipeline_mode<synchronous>, transform_indices = @transform_4, window_bounds = array<i64: 16, 256>}]} {
    %c0 = arith.constant 0 : index
    %c0_0 = arith.constant 0 : index
    %0 = vector.load %arg1[%c0, %c0_0] : memref<8x320xf32, #tpu.memory_space<vmem>>, vector<8x320xf32>
    %c0_1 = arith.constant 0 : index
    %c0_2 = arith.constant 0 : index
    %1 = vector.load %arg2[%c0_1, %c0_2] : memref<8x9xf32, #tpu.memory_space<vmem>>, vector<8x9xf32>
    %c0_3 = arith.constant 0 : index
    %c0_4 = arith.constant 0 : index
    %2 = vector.load %arg3[%c0_3, %c0_4] : memref<8x4xf32, #tpu.memory_space<vmem>>, vector<8x4xf32>
    %3 = tpu.iota {dimensions = array<i32: 1>} : vector<1x256xi32>
    %c16_i32 = arith.constant 16 : i32
    %c0_i32 = arith.constant 0 : i32
    %4 = arith.cmpi eq, %c16_i32, %c0_i32 : i32
    %c1_i32 = arith.constant 1 : i32
    %5 = arith.select %4, %c1_i32, %c16_i32 : i32
    %6 = vector.broadcast %5 : i32 to vector<1x256xi32>
    %7 = arith.remsi %3, %6 : vector<1x256xi32>
    %c0_i32_5 = arith.constant 0 : i32
    %8 = vector.broadcast %c0_i32_5 : i32 to vector<1x256xi32>
    %9 = arith.cmpi ne, %7, %8 : vector<1x256xi32>
    %c0_i32_6 = arith.constant 0 : i32
    %10 = vector.broadcast %c0_i32_6 : i32 to vector<1x256xi32>
    %11 = arith.cmpi slt, %7, %10 : vector<1x256xi32>
    %c0_i32_7 = arith.constant 0 : i32
    %12 = arith.cmpi slt, %5, %c0_i32_7 : i32
    %13 = vector.broadcast %12 : i1 to vector<1x256xi1>
    %14 = vector.broadcast %13 : vector<1x256xi1> to vector<1x256xi1>
    %15 = arith.xori %11, %14 : vector<1x256xi1>
    %16 = arith.andi %15, %9 : vector<1x256xi1>
    %17 = vector.broadcast %5 : i32 to vector<1x256xi32>
    %18 = arith.addi %7, %17 : vector<1x256xi32>
    %19 = arith.select %16, %18, %7 : vector<1x256xi1>, vector<1x256xi32>
    %c0_i32_8 = arith.constant 0 : i32
    %20 = vector.broadcast %c0_i32_8 : i32 to vector<1x256xi32>
    %21 = arith.cmpi ne, %19, %20 : vector<1x256xi32>
    %c15_i32 = arith.constant 15 : i32
    %22 = vector.broadcast %c15_i32 : i32 to vector<1x256xi32>
    %23 = arith.cmpi ne, %19, %22 : vector<1x256xi32>
    %c0_9 = arith.constant 0 : index
    %c0_10 = arith.constant 0 : index
    %24 = vector.load %arg4[%c0_9, %c0_10] : memref<8x1xf32, #tpu.memory_space<vmem>>, vector<8x1xf32>
    %25 = vector.shape_cast %24 : vector<8x1xf32> to vector<8x1xf32>
    %26 = vector.broadcast %25 : vector<8x1xf32> to vector<8x256xf32>
    %cst = arith.constant 0.000000e+00 : f32
    %27 = vector.broadcast %cst : f32 to vector<8x256xf32>
    %cst_11 = arith.constant 0.000000e+00 : f32
    %28 = vector.broadcast %cst_11 : f32 to vector<8x256xf32>
    %29 = vector.extract_strided_slice %0 {offsets = [0, 15], sizes = [8, 256], strides = [1, 1]} : vector<8x320xf32> to vector<8x256xf32>
    %30 = vector.extract_strided_slice %1 {offsets = [0, 0], sizes = [8, 1], strides = [1, 1]} : vector<8x9xf32> to vector<8x1xf32>
    %31 = vector.broadcast %30 : vector<8x1xf32> to vector<8x256xf32>
    %32 = arith.mulf %29, %31 : vector<8x256xf32>
    %33 = arith.addf %28, %32 : vector<8x256xf32>
    %34 = vector.extract_strided_slice %0 {offsets = [0, 31], sizes = [8, 256], strides = [1, 1]} : vector<8x320xf32> to vector<8x256xf32>
    %35 = vector.extract_strided_slice %1 {offsets = [0, 3], sizes = [8, 1], strides = [1, 1]} : vector<8x9xf32> to vector<8x1xf32>
    %36 = vector.broadcast %35 : vector<8x1xf32> to vector<8x256xf32>
    %37 = arith.mulf %34, %36 : vector<8x256xf32>
    %38 = arith.addf %33, %37 : vector<8x256xf32>
    %39 = vector.extract_strided_slice %0 {offsets = [0, 47], sizes = [8, 256], strides = [1, 1]} : vector<8x320xf32> to vector<8x256xf32>
    %40 = vector.extract_strided_slice %1 {offsets = [0, 6], sizes = [8, 1], strides = [1, 1]} : vector<8x9xf32> to vector<8x1xf32>
    %41 = vector.broadcast %40 : vector<8x1xf32> to vector<8x256xf32>
    %42 = arith.mulf %39, %41 : vector<8x256xf32>
    %43 = arith.addf %38, %42 : vector<8x256xf32>
    %cst_12 = arith.constant 0.000000e+00 : f32
    %44 = vector.shape_cast %21 : vector<1x256xi1> to vector<1x256xi1>
    %45 = vector.broadcast %44 : vector<1x256xi1> to vector<8x256xi1>
    %46 = vector.broadcast %cst_12 : f32 to vector<8x256xf32>
    %47 = arith.select %45, %43, %46 : vector<8x256xi1>, vector<8x256xf32>
    %48 = arith.addf %27, %47 : vector<8x256xf32>
    %cst_13 = arith.constant 0.000000e+00 : f32
    %49 = vector.broadcast %cst_13 : f32 to vector<8x256xf32>
    %50 = vector.extract_strided_slice %0 {offsets = [0, 16], sizes = [8, 256], strides = [1, 1]} : vector<8x320xf32> to vector<8x256xf32>
    %51 = vector.extract_strided_slice %1 {offsets = [0, 1], sizes = [8, 1], strides = [1, 1]} : vector<8x9xf32> to vector<8x1xf32>
    %52 = vector.broadcast %51 : vector<8x1xf32> to vector<8x256xf32>
    %53 = arith.mulf %50, %52 : vector<8x256xf32>
    %54 = arith.addf %49, %53 : vector<8x256xf32>
    %55 = vector.extract_strided_slice %0 {offsets = [0, 32], sizes = [8, 256], strides = [1, 1]} : vector<8x320xf32> to vector<8x256xf32>
    %56 = vector.extract_strided_slice %1 {offsets = [0, 4], sizes = [8, 1], strides = [1, 1]} : vector<8x9xf32> to vector<8x1xf32>
    %57 = vector.broadcast %56 : vector<8x1xf32> to vector<8x256xf32>
    %58 = arith.mulf %55, %57 : vector<8x256xf32>
    %59 = arith.addf %54, %58 : vector<8x256xf32>
    %60 = vector.extract_strided_slice %0 {offsets = [0, 48], sizes = [8, 256], strides = [1, 1]} : vector<8x320xf32> to vector<8x256xf32>
    %61 = vector.extract_strided_slice %1 {offsets = [0, 7], sizes = [8, 1], strides = [1, 1]} : vector<8x9xf32> to vector<8x1xf32>
    %62 = vector.broadcast %61 : vector<8x1xf32> to vector<8x256xf32>
    %63 = arith.mulf %60, %62 : vector<8x256xf32>
    %64 = arith.addf %59, %63 : vector<8x256xf32>
    %65 = arith.addf %48, %64 : vector<8x256xf32>
    %cst_14 = arith.constant 0.000000e+00 : f32
    %66 = vector.broadcast %cst_14 : f32 to vector<8x256xf32>
    %67 = vector.extract_strided_slice %0 {offsets = [0, 17], sizes = [8, 256], strides = [1, 1]} : vector<8x320xf32> to vector<8x256xf32>
    %68 = vector.extract_strided_slice %1 {offsets = [0, 2], sizes = [8, 1], strides = [1, 1]} : vector<8x9xf32> to vector<8x1xf32>
    %69 = vector.broadcast %68 : vector<8x1xf32> to vector<8x256xf32>
    %70 = arith.mulf %67, %69 : vector<8x256xf32>
    %71 = arith.addf %66, %70 : vector<8x256xf32>
    %72 = vector.extract_strided_slice %0 {offsets = [0, 33], sizes = [8, 256], strides = [1, 1]} : vector<8x320xf32> to vector<8x256xf32>
    %73 = vector.extract_strided_slice %1 {offsets = [0, 5], sizes = [8, 1], strides = [1, 1]} : vector<8x9xf32> to vector<8x1xf32>
    %74 = vector.broadcast %73 : vector<8x1xf32> to vector<8x256xf32>
    %75 = arith.mulf %72, %74 : vector<8x256xf32>
    %76 = arith.addf %71, %75 : vector<8x256xf32>
    %77 = vector.extract_strided_slice %0 {offsets = [0, 49], sizes = [8, 256], strides = [1, 1]} : vector<8x320xf32> to vector<8x256xf32>
    %78 = vector.extract_strided_slice %1 {offsets = [0, 8], sizes = [8, 1], strides = [1, 1]} : vector<8x9xf32> to vector<8x1xf32>
    %79 = vector.broadcast %78 : vector<8x1xf32> to vector<8x256xf32>
    %80 = arith.mulf %77, %79 : vector<8x256xf32>
    %81 = arith.addf %76, %80 : vector<8x256xf32>
    %cst_15 = arith.constant 0.000000e+00 : f32
    %82 = vector.shape_cast %23 : vector<1x256xi1> to vector<1x256xi1>
    %83 = vector.broadcast %82 : vector<1x256xi1> to vector<8x256xi1>
    %84 = vector.broadcast %cst_15 : f32 to vector<8x256xf32>
    %85 = arith.select %83, %81, %84 : vector<8x256xi1>, vector<8x256xf32>
    %86 = arith.addf %65, %85 : vector<8x256xf32>
    %87 = vector.extract_strided_slice %2 {offsets = [0, 0], sizes = [8, 1], strides = [1, 1]} : vector<8x4xf32> to vector<8x1xf32>
    %88 = vector.extract_strided_slice %86 {offsets = [0, 0], sizes = [1, 256], strides = [1, 1]} : vector<8x256xf32> to vector<1x256xf32>
    %89 = vector.broadcast %87 : vector<8x1xf32> to vector<8x256xf32>
    %90 = vector.broadcast %88 : vector<1x256xf32> to vector<8x256xf32>
    %91 = arith.mulf %89, %90 : vector<8x256xf32>
    %92 = arith.addf %26, %91 : vector<8x256xf32>
    %93 = vector.extract_strided_slice %2 {offsets = [0, 1], sizes = [8, 1], strides = [1, 1]} : vector<8x4xf32> to vector<8x1xf32>
    %94 = vector.extract_strided_slice %86 {offsets = [1, 0], sizes = [1, 256], strides = [1, 1]} : vector<8x256xf32> to vector<1x256xf32>
    %95 = vector.broadcast %93 : vector<8x1xf32> to vector<8x256xf32>
    %96 = vector.broadcast %94 : vector<1x256xf32> to vector<8x256xf32>
    %97 = arith.mulf %95, %96 : vector<8x256xf32>
    %98 = arith.addf %92, %97 : vector<8x256xf32>
    %99 = vector.extract_strided_slice %2 {offsets = [0, 2], sizes = [8, 1], strides = [1, 1]} : vector<8x4xf32> to vector<8x1xf32>
    %100 = vector.extract_strided_slice %86 {offsets = [2, 0], sizes = [1, 256], strides = [1, 1]} : vector<8x256xf32> to vector<1x256xf32>
    %101 = vector.broadcast %99 : vector<8x1xf32> to vector<8x256xf32>
    %102 = vector.broadcast %100 : vector<1x256xf32> to vector<8x256xf32>
    %103 = arith.mulf %101, %102 : vector<8x256xf32>
    %104 = arith.addf %98, %103 : vector<8x256xf32>
    %105 = vector.extract_strided_slice %2 {offsets = [0, 3], sizes = [8, 1], strides = [1, 1]} : vector<8x4xf32> to vector<8x1xf32>
    %106 = vector.extract_strided_slice %86 {offsets = [3, 0], sizes = [1, 256], strides = [1, 1]} : vector<8x256xf32> to vector<1x256xf32>
    %107 = vector.broadcast %105 : vector<8x1xf32> to vector<8x256xf32>
    %108 = vector.broadcast %106 : vector<1x256xf32> to vector<8x256xf32>
    %109 = arith.mulf %107, %108 : vector<8x256xf32>
    %110 = arith.addf %104, %109 : vector<8x256xf32>
    %c0_16 = arith.constant 0 : index
    %c0_17 = arith.constant 0 : index
    %111 = vector.load %arg5[%c0_16, %c0_17] : memref<16x256xf32, #tpu.memory_space<vmem>>, vector<8x256xf32>
    tpu.vector_store %arg5[%c0_16, %c0_17], %110 {strides = array<i32>} : memref<16x256xf32, #tpu.memory_space<vmem>>, vector<8x256xf32>,
    %112 = vector.extract_strided_slice %2 {offsets = [0, 0], sizes = [8, 1], strides = [1, 1]} : vector<8x4xf32> to vector<8x1xf32>
    %113 = vector.extract_strided_slice %86 {offsets = [4, 0], sizes = [1, 256], strides = [1, 1]} : vector<8x256xf32> to vector<1x256xf32>
    %114 = vector.broadcast %112 : vector<8x1xf32> to vector<8x256xf32>
    %115 = vector.broadcast %113 : vector<1x256xf32> to vector<8x256xf32>
    %116 = arith.mulf %114, %115 : vector<8x256xf32>
    %117 = arith.addf %26, %116 : vector<8x256xf32>
    %118 = vector.extract_strided_slice %2 {offsets = [0, 1], sizes = [8, 1], strides = [1, 1]} : vector<8x4xf32> to vector<8x1xf32>
    %119 = vector.extract_strided_slice %86 {offsets = [5, 0], sizes = [1, 256], strides = [1, 1]} : vector<8x256xf32> to vector<1x256xf32>
    %120 = vector.broadcast %118 : vector<8x1xf32> to vector<8x256xf32>
    %121 = vector.broadcast %119 : vector<1x256xf32> to vector<8x256xf32>
    %122 = arith.mulf %120, %121 : vector<8x256xf32>
    %123 = arith.addf %117, %122 : vector<8x256xf32>
    %124 = vector.extract_strided_slice %2 {offsets = [0, 2], sizes = [8, 1], strides = [1, 1]} : vector<8x4xf32> to vector<8x1xf32>
    %125 = vector.extract_strided_slice %86 {offsets = [6, 0], sizes = [1, 256], strides = [1, 1]} : vector<8x256xf32> to vector<1x256xf32>
    %126 = vector.broadcast %124 : vector<8x1xf32> to vector<8x256xf32>
    %127 = vector.broadcast %125 : vector<1x256xf32> to vector<8x256xf32>
    %128 = arith.mulf %126, %127 : vector<8x256xf32>
    %129 = arith.addf %123, %128 : vector<8x256xf32>
    %130 = vector.extract_strided_slice %2 {offsets = [0, 3], sizes = [8, 1], strides = [1, 1]} : vector<8x4xf32> to vector<8x1xf32>
    %131 = vector.extract_strided_slice %86 {offsets = [7, 0], sizes = [1, 256], strides = [1, 1]} : vector<8x256xf32> to vector<1x256xf32>
    %132 = vector.broadcast %130 : vector<8x1xf32> to vector<8x256xf32>
    %133 = vector.broadcast %131 : vector<1x256xf32> to vector<8x256xf32>
    %134 = arith.mulf %132, %133 : vector<8x256xf32>
    %135 = arith.addf %129, %134 : vector<8x256xf32>
    %c8 = arith.constant 8 : index
    %c0_18 = arith.constant 0 : index
    %136 = vector.load %arg5[%c8, %c0_18] : memref<16x256xf32, #tpu.memory_space<vmem>>, vector<8x256xf32>
    tpu.vector_store %arg5[%c8, %c0_18], %135 {strides = array<i32>} : memref<16x256xf32, #tpu.memory_space<vmem>>, vector<8x256xf32>,
    return
  }
  func.func @transform_0(%arg0: i32) -> (i32, i32) {
    %c0_i32 = arith.constant 0 : i32
    %c0_i32_0 = arith.constant 0 : i32
    %c0_i32_1 = arith.constant 0 : i32
    return %c0_i32, %c0_i32_0 : i32, i32
  }
  func.func @transform_1(%arg0: i32) -> (i32, i32) {
    %c0_i32 = arith.constant 0 : i32
    %c0_i32_0 = arith.constant 0 : i32
    %c0_i32_1 = arith.constant 0 : i32
    return %c0_i32, %c0_i32_0 : i32, i32
  }
  func.func @transform_2(%arg0: i32) -> (i32, i32) {
    %c0_i32 = arith.constant 0 : i32
    %c0_i32_0 = arith.constant 0 : i32
    %c0_i32_1 = arith.constant 0 : i32
    return %c0_i32, %c0_i32_0 : i32, i32
  }
  func.func @transform_3(%arg0: i32) -> (i32, i32) {
    %c0_i32 = arith.constant 0 : i32
    %c0_i32_0 = arith.constant 0 : i32
    %c0_i32_1 = arith.constant 0 : i32
    return %c0_i32, %c0_i32_0 : i32, i32
  }
  func.func @transform_4(%arg0: i32) -> (i32, i32) {
    %c0_i32 = arith.constant 0 : i32
    %c0_i32_0 = arith.constant 0 : i32
    %c0_i32_1 = arith.constant 0 : i32
    return %c0_i32, %c0_i32_0 : i32, i32
  }
}

</mosaic_0001>

<bundles_post_ra>
// kernel: tpu_custom_call.1
= control target key start
LH: loop header
LB: loop body
LE: loop exit
PB: predicated region body
PF: predicated region fallthrough
CT: control target
= control target key end

     0   :  { %9 = vsyncpa [#allocation3], 0  ;;  %s614_s0 = inlined_call_operand.hbm [shape: f32[8,320], index: 0, kind: input, shape index: {}]   ;;  %s615_s1 = inlined_call_operand.vmem [shape: f32[8,9], index: 1, kind: input, shape index: {}]   ;;  %s616_s2 = inlined_call_operand.vmem [shape: f32[8,4], index: 2, kind: input, shape index: {}]   ;;  %s617_s3 = inlined_call_operand.vmem [shape: f32[8,1], index: 3, kind: input, shape index: {}]   ;;  %s618_s4 = inlined_call_operand.hbm [shape: f32[16,256], index: 4, kind: output, shape index: {}]  }
   0x1   :  { %10 = vsyncpa [#allocation4], 0  ;;  %s16_s17 = sshll.u32 %s614_s0, 4  ;;  %s480_s18 = smov [#allocation2]   ;;  %s17_s17 = int_to_ptr.hbm [resolvable:$true] %s16_s17 }
   0x2   :  { %s18_s19 = sshll.u32 %s480_s18, 4  ;;  %s19_s19 = int_to_ptr.vmem [resolvable:$true] %s18_s19 }
   0x3   :  { %21 = dma.hbm_to_vmem [thread:$0]  %s17_s17, 384, %s19_s19, [#allocation3]  }
   0x4   :  { %476 = dma.done.wait [#allocation3], 384  }
   0x5   :  { %477 = vsyncadd [#allocation3], 4294966912  ;;  %v481_v0 = vmov 3   ;;  %v482_v1 = vmov 6   ;;  %v483_v2 = vmov 4   ;;  %v35_v3 = vld [vmem:[%s615_s1] sm:$0xff] }
   0x6   :  { %415 = vset.pattern.permute.xlu1 %v481_v0  ;;  %417 = vset.pattern.permute.xlu0 %v482_v1  ;;  %v484_v4 = vmov 5   ;;  %v485_v5 = vmov 2   ;;  %v486_v6 = vmov 7   ;;  %v68_v7 = vld [vmem:[%s617_s3] sm:$0xff]  ;;  %v487_v8 = vmov 8   ;;  %v534_v12 = vld [vmem:[#allocation2 + $0x8] sm:$0xff] }
   0x7   :  { %416 = vset.pattern.permute.xlu2 %v483_v2  ;;  %86 = vperm.xlu1 %415, %v35_v3   ;;  %v488_v9 = vmov 0   ;;  %v489_v10 = vmov 1   ;;  %v532_v11 = vld [vmem:[#allocation2] sm:$0xff]  ;;  %s490_s1 = smov 112   ;;  %s491_s3 = smov 96   ;;  %v542_v19 = vld [vmem:[#allocation2 + $0x10] sm:$0xff] }
   0x8   :  { %111 = vperm.xlu0 %417, %v35_v3   ;;  %168 = vperm.xlu2 %416, %v35_v3   ;;  %vm101_vm0 = vcmask 916480   ;;  %vm126_vm1 = vcmask 785408   ;;  %s492_s23 = smov 113   ;;  %s493_s24 = smov 111   ;;  %vm148_vm2 = vcmask 924672   ;;  %vm301_vm5 = vcmask 908288  }
   0x9   :  { %s385_s30 = sshll.u32 %s618_s4, 4  ;;  %s495_s5 = smov 256   ;;  %s386_s30 = int_to_ptr.hbm [resolvable:$true] %s385_s30 }
   0xa   :  { %s496_s6 = smov 16  }
   0xf   :  { %418 = vset.pattern.permute.xlu1 %v484_v4 }
  0x10   :  { %422 = vset.pattern.permute.xlu0 %v485_v5  ;;  %241 = vperm.xlu1 %418, %v35_v3  }
  0x11   :  { %419 = vset.pattern.permute.xlu2 %v486_v6  ;;  %231 = vperm.xlu0 %422, %v35_v3  }
  0x12   :  { %192 = vperm.xlu2 %419, %v35_v3  }
  0x18   :  { %420 = vset.pattern.permute.xlu1 %v487_v8 }
  0x19   :  { %265 = vperm.xlu1 %420, %v35_v3   ;;  %423 = vset.pattern.permute.xlu0 %v488_v9 }
  0x1a   :  { %71 = vperm.xlu0 %423, %v68_v7   ;;  %421 = vset.pattern.permute.xlu2 %v489_v10 }
  0x1b   :  { %158 = vperm.xlu2 %421, %v35_v3  }
  0x21   :  { %424 = vset.pattern.permute.xlu1 %v489_v10 }
  0x22   :  { %76 = vperm.xlu0 %423, %v35_v3  }
  0x23   :  { %425 = vset.pattern.permute.xlu2 %v485_v5 }
  0x62   :  { %v169_v18 = vpop.permute.xlu2 %168 }
  0x63   :  { %v171_v21 = vmul.f32 %v169_v18, %v532_v11  ;;  %v172_v25 = vmul.f32 %v169_v18, %v534_v12  ;;  %v173_v26 = vmul.f32 %v169_v18, %v542_v19 }
  0x6c   :  { %v193_v24 = vpop.permute.xlu2 %192 }
  0x6d   :  { %v195_v27 = vmul.f32 %v193_v24, %v532_v11  ;;  %v196_v34 = vmul.f32 %v193_v24, %v534_v12  ;;  %v197_v35 = vmul.f32 %v193_v24, %v542_v19 }
  0x75   :  { %v159_v38 = vpop.permute.xlu2 %158 }
  0x76   :  { %v163_v2 = vmul.f32 %v159_v38, %v542_v19 }
  0x79   :  { %v87_v13 = vpop.permute.xlu1 %86 }
  0x7a   :  { %v112_v14 = vpop.permute.xlu0 %111  ;;  %v89_v15 = vmul.f32 %v87_v13, %v532_v11  ;;  %v90_v16 = vmul.f32 %v87_v13, %v534_v12  ;;  %v91_v22 = vmul.f32 %v87_v13, %v542_v19 }
  0x7b   :  { %v114_v17 = vmul.f32 %v112_v14, %v532_v11  ;;  %v115_v20 = vmul.f32 %v112_v14, %v534_v12  ;;  %v116_v31 = vmul.f32 %v112_v14, %v542_v19  ;;  %v161_v14 = vmul.f32 %v159_v38, %v532_v11 }
  0x7c   :  { %97 = vrot.lane.b32.xlu2 %v90_v16, %s490_s1  ;;  %95 = vrot.lane.b32.xlu1 %v89_v15, %s490_s1  ;;  %v162_v15 = vmul.f32 %v159_v38, %v534_v12  ;;  %v36_v38 = vld [vmem:[%s616_s2] sm:$0xff]  ;;  %s494_s2 = smov [#allocation5]  }
  0x7d   :  { %120 = vrot.lane.b32.xlu0 %v114_v17, %s491_s3  ;;  %s383_s27 = sshll.u32 %s494_s2, 4  ;;  %s384_s27 = int_to_ptr.vmem [resolvable:$true] %s383_s27 }
  0x82   :  { %v242_v23 = vpop.permute.xlu1 %241 }
  0x83   :  { %v244_v29 = vmul.f32 %v242_v23, %v532_v11  ;;  %v245_v32 = vmul.f32 %v242_v23, %v534_v12  ;;  %v246_v33 = vmul.f32 %v242_v23, %v542_v19  ;;  %v232_v39 = vpop.permute.xlu0 %231 }
  0x84   :  { %99 = vrot.lane.b32.xlu2 %v91_v22, %s490_s1  ;;  %122 = vrot.lane.b32.xlu1 %v115_v20, %s491_s3  ;;  %v236_v9 = vmul.f32 %v232_v39, %v542_v19 }
  0x85   :  { %177 = vrot.lane.b32.xlu0 %v171_v21, %s490_s1 }
  0x8b   :  { %v266_v28 = vpop.permute.xlu1 %265 }
  0x8c   :  { %181 = vrot.lane.b32.xlu2 %v173_v26, %s490_s1  ;;  %179 = vrot.lane.b32.xlu1 %v172_v25, %s490_s1  ;;  %v268_v30 = vmul.f32 %v266_v28, %v532_v11  ;;  %v269_v36 = vmul.f32 %v266_v28, %v534_v12  ;;  %v270_v37 = vmul.f32 %v266_v28, %v542_v19  ;;  %v574_v41 = vpop.permute.xlu0 %71 }
  0x8d   :  { %201 = vrot.lane.b32.xlu0 %v195_v27, %s491_s3  ;;  %v234_v28 = vmul.f32 %v232_v39, %v532_v11 }
  0x94   :  { %250 = vrot.lane.b32.xlu2 %v244_v29, %s490_s1  ;;  %124 = vrot.lane.b32.xlu1 %v116_v31, %s491_s3  ;;  %v77_v43 = vpop.permute.xlu0 %76  ;;  %v235_v29 = vmul.f32 %v232_v39, %v534_v12 }
  0x95   :  { %274 = vrot.lane.b32.xlu0 %v268_v30, %s491_s3  ;;  %v79_v46 = vmul.f32 %v77_v43, %v532_v11  ;;  %v81_v56 = vmul.f32 %v77_v43, %v542_v19  ;;  %v80_v57 = vmul.f32 %v77_v43, %v534_v12  ;;  %v37_v12 = vlaneseq }
  0x9c   :  { %254 = vrot.lane.b32.xlu2 %v246_v33, %s490_s1  ;;  %252 = vrot.lane.b32.xlu1 %v245_v32, %s490_s1 }
  0xa4   :  { %205 = vrot.lane.b32.xlu2 %v197_v35, %s491_s3  ;;  %203 = vrot.lane.b32.xlu1 %v196_v34, %s491_s3 }
  0xac   :  { %278 = vrot.lane.b32.xlu2 %v270_v37, %s491_s3  ;;  %276 = vrot.lane.b32.xlu1 %v269_v36, %s491_s3 }
  0xd6   :  { %v98_v40 = vpop.permute.xlu2 %97 }
  0xde   :  { %v100_v42 = vpop.permute.xlu2 %99 }
  0xdf   :  { %v103_v58 = vsel %vm101_vm0, %v98_v40, %v100_v42  ;;  %v109_v59 = vadd.f32 %v100_v42, %v81_v56  ;;  %v38_v42 = vand.u32 127, %v37_v12 }
  0xe0   :  { %v108_v60 = vadd.f32 %v103_v58, %v80_v57 }
  0xe6   :  { %v182_v44 = vpop.permute.xlu2 %181 }
  0xe7   :  { %v190_v5 = vadd.f32 %v182_v44, %v163_v2 }
  0xee   :  { %v96_v45 = vpop.permute.xlu1 %95  ;;  %v251_v49 = vpop.permute.xlu2 %250 }
  0xef   :  { %v102_v47 = vsel %vm101_vm0, %v96_v45, %v98_v40  ;;  %v121_v48 = vpop.permute.xlu0 %120 }
  0xf0   :  { %v107_v50 = vadd.f32 %v102_v47, %v79_v46  ;;  %v44_v47 = vand.u32 15, %v38_v42 }
  0xf2   :  { %vm64_vm3 = vcmp.ne.s32.totalorder %v44_v47, 0  ;;  %vm66_vm7 = vcmp.ne.s32.totalorder %v44_v47, 15 }
  0xf6   :  { %v123_v51 = vpop.permute.xlu1 %122  ;;  %v255_v55 = vpop.permute.xlu2 %254 }
  0xf7   :  { %v127_v52 = vsel %vm126_vm1, %v121_v48, %v123_v51  ;;  %v178_v4 = vpop.permute.xlu0 %177  ;;  %v263_v17 = vadd.f32 %v255_v55, %v236_v9 }
  0xf8   :  { %v132_v53 = vadd.f32 %v127_v52, %v107_v50 }
  0xfa   :  { %142 = vrot.lane.b32.xlu0 %v132_v53, %s492_s23 }
  0xfe   :  { %v180_v54 = vpop.permute.xlu1 %179  ;;  %v206_v3 = vpop.permute.xlu2 %205 }
  0xff   :  { %v214_v7 = vadd.f32 %v206_v3, %v190_v5  ;;  %v202_v8 = vpop.permute.xlu0 %201  ;;  %v183_v10 = vsel %vm101_vm0, %v178_v4, %v180_v54  ;;  %v184_v13 = vsel %vm101_vm0, %v180_v54, %v182_v44  ;;  %v39_v44 = vadd.s32 128, %v38_v42 }
 0x100   :  { %v188_v18 = vadd.f32 %v183_v10, %v161_v14  ;;  %v189_v20 = vadd.f32 %v184_v13, %v162_v15 }
 0x101   :  { %v51_v48 = vand.u32 15, %v39_v44 }
 0x103   :  { %vm65_vm4 = vcmp.ne.s32.totalorder %v51_v48, 0  ;;  %vm67_vm6 = vcmp.ne.s32.totalorder %v51_v48, 15 }
 0x106   :  { %v125_v61 = vpop.permute.xlu1 %124  ;;  %v279_v16 = vpop.permute.xlu2 %278 }
 0x107   :  { %v128_v62 = vsel %vm126_vm1, %v123_v51, %v125_v61  ;;  %v134_v63 = vadd.f32 %v125_v61, %v109_v59  ;;  %v287_v22 = vadd.f32 %v279_v16, %v263_v17  ;;  %v275_v30 = vpop.permute.xlu0 %274 }
 0x108   :  { %v133_v1 = vadd.f32 %v128_v62, %v108_v60 }
 0x109   :  { %146 = vrot.lane.b32.xlu2 %v134_v63, %s492_s23 }
 0x10a   :  { %144 = vrot.lane.b32.xlu1 %v133_v1, %s492_s23 }
 0x10e   :  { %v253_v6 = vpop.permute.xlu1 %252 }
 0x10f   :  { %v256_v26 = vsel %vm101_vm0, %v251_v49, %v253_v6  ;;  %v257_v27 = vsel %vm101_vm0, %v253_v6, %v255_v55 }
 0x110   :  { %v261_v31 = vadd.f32 %v256_v26, %v234_v28  ;;  %v262_v32 = vadd.f32 %v257_v27, %v235_v29 }
 0x111   :  { %222 = vrot.lane.b32.xlu2 %v214_v7, %s490_s1 }
 0x116   :  { %v204_v21 = vpop.permute.xlu1 %203 }
 0x117   :  { %v207_v23 = vsel %vm126_vm1, %v202_v8, %v204_v21  ;;  %v208_v24 = vsel %vm126_vm1, %v204_v21, %v206_v3 }
 0x118   :  { %v212_v25 = vadd.f32 %v207_v23, %v188_v18  ;;  %v213_v19 = vadd.f32 %v208_v24, %v189_v20 }
 0x119   :  { %299 = vrot.lane.b32.xlu2 %v287_v22, %s493_s24 }
 0x11a   :  { %220 = vrot.lane.b32.xlu1 %v213_v19, %s490_s1  ;;  %218 = vrot.lane.b32.xlu0 %v212_v25, %s490_s1 }
 0x11e   :  { %v277_v33 = vpop.permute.xlu1 %276 }
 0x11f   :  { %v280_v34 = vsel %vm126_vm1, %v275_v30, %v277_v33  ;;  %v281_v35 = vsel %vm126_vm1, %v277_v33, %v279_v16 }
 0x120   :  { %v285_v36 = vadd.f32 %v280_v34, %v261_v31  ;;  %v286_v37 = vadd.f32 %v281_v35, %v262_v32 }
 0x121   :  { %332 = vperm.xlu2 %425, %v36_v38  }
 0x122   :  { %297 = vrot.lane.b32.xlu1 %v286_v37, %s493_s24  ;;  %295 = vrot.lane.b32.xlu0 %v285_v36, %s493_s24 }
 0x12a   :  { %322 = vperm.xlu1 %424, %v36_v38   ;;  %312 = vperm.xlu0 %423, %v36_v38  }
 0x132   :  { %426 = vset.pattern.permute.xlu1 %v481_v0  ;;  %427 = vset.pattern.permute.xlu0 %v481_v0 }
 0x133   :  { %342 = vperm.xlu1 %426, %v36_v38  }
 0x163   :  { %v147_v11 = vpop.permute.xlu2 %146 }
 0x16b   :  { %v223_v43 = vpop.permute.xlu2 %222 }
 0x16c   :  { %v143_v39 = vpop.permute.xlu0 %142 }
 0x173   :  { %v300_v52 = vpop.permute.xlu2 %299 }
 0x17b   :  { %v333_v25 = vpop.permute.xlu2 %332 }
 0x17c   :  { %v145_v40 = vpop.permute.xlu1 %144 }
 0x17d   :  { %v149_v49 = vsel %vm148_vm2, %v143_v39, %v145_v40  ;;  %v150_v50 = vsel %vm148_vm2, %v145_v40, %v147_v11 }
 0x17e   :  { %v153_v53 = vsel %vm64_vm3, %v149_v49, 0.0  ;;  %v154_v54 = vsel %vm65_vm4, %v150_v50, 0.0 }
 0x18c   :  { %v221_v45 = vpop.permute.xlu1 %220  ;;  %v219_v46 = vpop.permute.xlu0 %218 }
 0x18d   :  { %v225_v51 = vsel %vm101_vm0, %v221_v45, %v223_v43  ;;  %v224_v0 = vsel %vm101_vm0, %v219_v46, %v221_v45 }
 0x18e   :  { %v229_v57 = vadd.f32 %v225_v51, %v154_v54  ;;  %v228_v58 = vadd.f32 %v224_v0, %v153_v53 }
 0x194   :  { %v298_v55 = vpop.permute.xlu1 %297  ;;  %v296_v56 = vpop.permute.xlu0 %295 }
 0x195   :  { %v303_v59 = vsel %vm301_vm5, %v298_v55, %v300_v52  ;;  %v302_v60 = vsel %vm301_vm5, %v296_v56, %v298_v55 }
 0x196   :  { %v307_v61 = vsel %vm67_vm6, %v303_v59, 0.0  ;;  %v306_v62 = vsel %vm66_vm7, %v302_v60, 0.0 }
 0x197   :  { %v309_v63 = vadd.f32 %v307_v61, %v229_v57  ;;  %v308_v1 = vadd.f32 %v306_v62, %v228_v58 }
 0x199   :  { %v335_v2 = vperm.slane %v308_v1, 2  ;;  %v336_v3 = vperm.slane %v309_v63, 2  ;;  %v315_v5 = vperm.slane %v308_v1, 0  ;;  %v316_v6 = vperm.slane %v309_v63, 0 }
 0x19a   :  { %v353_v7 = vperm.slane %v308_v1, 4  ;;  %v354_v8 = vperm.slane %v309_v63, 4  ;;  %v365_v10 = vperm.slane %v308_v1, 6  ;;  %v326_v13 = vperm.slane %v309_v63, 1 }
 0x19b   :  { %v325_v14 = vperm.slane %v308_v1, 1  ;;  %v359_v15 = vperm.slane %v308_v1, 5  ;;  %v360_v21 = vperm.slane %v309_v63, 5  ;;  %v366_v29 = vperm.slane %v309_v63, 6 }
 0x19c   :  { %v323_v4 = vpop.permute.xlu1 %322  ;;  %v313_v9 = vpop.permute.xlu0 %312  ;;  %v337_v34 = vmul.f32 %v335_v2, %v333_v25  ;;  %v338_v35 = vmul.f32 %v336_v3, %v333_v25  ;;  %v367_v36 = vmul.f32 %v365_v10, %v333_v25  ;;  %v346_v38 = vperm.slane %v309_v63, 3 }
 0x19d   :  { %v317_v16 = vmul.f32 %v315_v5, %v313_v9  ;;  %v318_v17 = vmul.f32 %v316_v6, %v313_v9  ;;  %v355_v18 = vmul.f32 %v353_v7, %v313_v9  ;;  %v356_v20 = vmul.f32 %v354_v8, %v313_v9 }
 0x19e   :  { %v327_v22 = vmul.f32 %v325_v14, %v323_v4  ;;  %v328_v23 = vmul.f32 %v326_v13, %v323_v4  ;;  %v361_v24 = vmul.f32 %v359_v15, %v323_v4  ;;  %v362_v30 = vmul.f32 %v360_v21, %v323_v4 }
 0x19f   :  { %v319_v19 = vadd.f32 %v317_v16, %v574_v41  ;;  %v320_v26 = vadd.f32 %v318_v17, %v574_v41  ;;  %v357_v27 = vadd.f32 %v355_v18, %v574_v41  ;;  %v358_v28 = vadd.f32 %v356_v20, %v574_v41 }
 0x1a0   :  { %v372_v11 = vperm.slane %v309_v63, 7  ;;  %v345_v12 = vperm.slane %v308_v1, 3  ;;  %v371_v39 = vperm.slane %v308_v1, 7  ;;  %v368_v40 = vmul.f32 %v366_v29, %v333_v25 }
 0x1a1   :  { %v329_v31 = vadd.f32 %v327_v22, %v319_v19  ;;  %v330_v32 = vadd.f32 %v328_v23, %v320_v26  ;;  %v363_v33 = vadd.f32 %v361_v24, %v357_v27  ;;  %v364_v37 = vadd.f32 %v362_v30, %v358_v28 }
 0x1a3   :  { %v339_v43 = vadd.f32 %v337_v34, %v329_v31  ;;  %v340_v44 = vadd.f32 %v338_v35, %v330_v32  ;;  %v369_v45 = vadd.f32 %v367_v36, %v363_v33  ;;  %v370_v49 = vadd.f32 %v368_v40, %v364_v37 }
 0x1a5   :  { %v343_v42 = vpop.permute.xlu1 %342 }
 0x1a6   :  { %v347_v46 = vmul.f32 %v345_v12, %v343_v42  ;;  %v348_v41 = vmul.f32 %v346_v38, %v343_v42  ;;  %v373_v47 = vmul.f32 %v371_v39, %v343_v42  ;;  %v374_v48 = vmul.f32 %v372_v11, %v343_v42 }
 0x1a8   :  { %v349_v50 = vadd.f32 %v347_v46, %v339_v43  ;;  %v350_v51 = vadd.f32 %v348_v41, %v340_v44  ;;  %v375_v0 = vadd.f32 %v373_v47, %v369_v45  ;;  %v376_v52 = vadd.f32 %v374_v48, %v370_v49 }
 0x1aa   :  { %351 = vst [vmem:[#allocation5] sm:$0xff] %v349_v50 }
 0x1ab   :  { %352 = vst [vmem:[#allocation5 + $0x8] sm:$0xff] %v350_v51 }
 0x1ac   :  { %377 = vst [vmem:[#allocation5 + $0x10] sm:$0xff] %v375_v0 }
 0x1ad   :  { %378 = vst [vmem:[#allocation5 + $0x18] sm:$0xff] %v376_v52 }
 0x1ae   :  { %391 = dma.vmem_to_hbm [thread:$0]  %s384_s27, 512, %s386_s30, [#allocation4], %s495_s5, %s495_s5, %s496_s6  }
 0x1af   :  { %478 = dma.done.wait [#allocation4], 512  }
 0x1b0   :  { %479 = vsyncadd [#allocation4], 4294966784 }
 0x1b1   :  { %396 = vsyncpa [#allocation3], 1 }
 0x1b2   :  { %397 = vsyncpa [#allocation4], 1 }

</bundles_post_ra>
